<compile_context>
chip_gen: v6e
topology: v6e:2x2x1
jax: 0.10.0
libtpu: 0.0.40
codegen_flags: <defaults>
</compile_context>

<pallas_src>
import functools

import jax
import jax.numpy as jnp
from jax.experimental import pallas as pl
from jax.experimental.pallas import tpu as pltpu


def clip_loss_kernel(scale_ref, img_ref, txt_ref,          # inputs
                     loss_ref, lpi_ref, lpt_ref,           # outputs
                     m_col, l_col, acc,                    # scratch
                     *, n_valid, needs_mask):
    i = pl.program_id(0)
    n = pl.num_programs(0)
    tq = img_ref.shape[0]
    bp = txt_ref.shape[0]

    @pl.when(i == 0)
    def _init():
        m_col[...] = jnp.full_like(m_col, -jnp.inf)
        l_col[...] = jnp.zeros_like(l_col)
        acc[0] = jnp.float32(0.0)

    scale = scale_ref[0, 0]                                # f32 scalar
    img = img_ref[...]                                     # (TQ, D) mxu dtype
    txt = txt_ref[...]                                     # (Bp, D) mxu dtype, resident

    # One MXU matmul per row tile, contracting D on both operands (no explicit
    # transpose of txt); bf16 operands, f32 accumulation; scale the f32 result.
    raw = jax.lax.dot_general(
        img, txt, dimension_numbers=(((1,), (1,)), ((), ())),
        preferred_element_type=jnp.float32)                # (TQ, Bp) f32
    logits = raw * scale

    # Cast once, then transpose: halves XLU / vst traffic for 16-bit outputs.
    # logits_per_text == logits_per_image.T.
    out_logits = logits.astype(lpi_ref.dtype)
    lpi_ref[...] = out_logits
    lpt_ref[...] = out_logits.T

    # Target (diagonal) logits for this row tile via a batched dot over D.
    start = pl.multiple_of(i * tq, tq)
    txt_rows = txt_ref[pl.ds(start, tq), :]
    diag = jnp.sum(img.astype(jnp.float32) * txt_rows.astype(jnp.float32),
                   axis=1, keepdims=True) * scale          # (TQ, 1)

    if needs_mask:
        neg_inf = jnp.float32(-jnp.inf)
        col_ids = jax.lax.broadcasted_iota(jnp.int32, (tq, bp), 1)
        row_ids = i * tq + jax.lax.broadcasted_iota(jnp.int32, (tq, 1), 0)
        row_valid = row_ids < n_valid                      # (TQ, 1)
        logits_row = jnp.where(col_ids < n_valid, logits, neg_inf)
        logits_col = jnp.where(row_valid, logits, neg_inf)
    else:
        row_valid = None
        logits_row = logits
        logits_col = logits

    # Image-side cross-entropy: row-wise logsumexp of this tile.
    m_row = jnp.max(logits_row, axis=1, keepdims=True)
    sum_row = jnp.sum(jnp.exp(logits_row - m_row), axis=1, keepdims=True)
    lse_row = m_row + jnp.log(sum_row)                     # (TQ, 1)
    per_row = lse_row - 2.0 * diag    # diag appears once per CE term (img & txt)
    if needs_mask:
        per_row = jnp.where(row_valid, per_row, 0.0)
    acc[0] = acc[0] + jnp.sum(per_row)

    # Text-side cross-entropy: running column-wise logsumexp (flash style).
    tile_max = jnp.max(logits_col, axis=0, keepdims=True)  # (1, Bp)
    m_new = jnp.maximum(m_col[...], tile_max)
    l_col[...] = (l_col[...] * jnp.exp(m_col[...] - m_new)
                  + jnp.sum(jnp.exp(logits_col - m_new), axis=0, keepdims=True))
    m_col[...] = m_new

    @pl.when(i == n - 1)
    def _finalize():
        col_lse = m_col[...] + jnp.log(l_col[...])         # (1, Bp)
        if needs_mask:
            col_ok = jax.lax.broadcasted_iota(jnp.int32, col_lse.shape, 1) < n_valid
            col_lse = jnp.where(col_ok, col_lse, 0.0)
        total = acc[0] + jnp.sum(col_lse)
        loss_ref[0, 0] = total / jnp.float32(2 * n_valid)


def _vmem_capacity_bytes():
    try:
        return int(pltpu.get_tpu_info().vmem_capacity_bytes)
    except Exception:
        return 128 * 1024 * 1024


def _row_tile_size():
    # v6e's 256x256 MXU prefers 256-row tiles; v5e (4x 128x128 MXU) and v7x
    # (64 MiB VMEM) prefer 128-row tiles.
    try:
        kind = jax.devices()[0].device_kind.lower()
    except Exception:
        kind = ""
    return 256 if "v6" in kind else 128


def _vmem_limit_bytes(bp, d, tq, feat_bytes, out_bytes, vmem_cap, txt_bufs):
    txt_res = txt_bufs * bp * d * feat_bytes               # resident text block
    img_tiles = 2 * tq * d * feat_bytes                    # double-buffered image tiles
    lpi_tiles = 2 * tq * bp * out_bytes                    # double-buffered output tiles
    lpt_tiles = 2 * bp * tq * out_bytes
    temporaries = (5 * 4 + 2 * out_bytes) * tq * bp        # f32 logits/exp + cast/transpose
    scratch = 2 * 8 * max(bp, 128) * 4 + 4096
    est = txt_res + img_tiles + lpi_tiles + lpt_tiles + temporaries + scratch
    cap = int(0.85 * vmem_cap)                             # never exceed physical VMEM
    return int(min(max(int(1.25 * est), 32 * 1024 * 1024), cap))


def clip_loss(image_features, text_features, logit_scale, *,
              mxu_dtype=jnp.bfloat16, out_dtype=None):
    """Pallas ClipLoss forward (world_size=1).

    Returns (total_loss, logits_per_image, logits_per_text), matching the
    PyTorch module's forward. MXU operands are cast to `mxu_dtype` (bf16 by
    default for full-rate MXU on all TPU generations; pass jnp.float32 for
    exact-f32 matmuls). Outputs default to the input feature dtype.
    """
    B, D = image_features.shape
    assert text_features.shape == (B, D)
    mxu_dtype = jnp.dtype(mxu_dtype)
    if out_dtype is None:
        out_dtype = jnp.promote_types(image_features.dtype, text_features.dtype)
    out_dtype = jnp.dtype(out_dtype)

    vmem_cap = _vmem_capacity_bytes()
    tq = _row_tile_size()
    bp = ((B + tq - 1) // tq) * tq                         # pad batch to the row tile
    needs_mask = bp != B
    grid = (bp // tq,)

    img = image_features
    txt = text_features
    if needs_mask:
        img = jnp.pad(img, ((0, bp - B), (0, 0)))
        txt = jnp.pad(txt, ((0, bp - B), (0, 0)))
    if img.dtype != mxu_dtype:
        img = img.astype(mxu_dtype)
    if txt.dtype != mxu_dtype:
        txt = txt.astype(mxu_dtype)

    scale = jnp.asarray(logit_scale, jnp.float32).reshape(1, 1)

    # Single-buffer the resident text block on small-VMEM chips (v7x): its
    # index_map is constant, so the second pipeline buffer is pure waste.
    single_buffer_txt = vmem_cap < 100 * 1024 * 1024
    txt_spec_kwargs = {"pipeline_mode": pl.Buffered(1)} if single_buffer_txt else {}

    kernel = functools.partial(clip_loss_kernel, n_valid=B, needs_mask=needs_mask)

    loss, lpi, lpt = pl.pallas_call(
        kernel,
        grid=grid,
        out_shape=(
            jax.ShapeDtypeStruct((1, 1), jnp.float32),     # total loss (scalar)
            jax.ShapeDtypeStruct((bp, bp), out_dtype),     # logits_per_image
            jax.ShapeDtypeStruct((bp, bp), out_dtype),     # logits_per_text
        ),
        in_specs=[
            pl.BlockSpec(memory_space=pltpu.SMEM),             # logit_scale (1,1)
            pl.BlockSpec((tq, D), lambda i: (i, 0)),           # image row tile
            pl.BlockSpec((bp, D), lambda i: (0, 0),            # text, resident
                         **txt_spec_kwargs),
        ],
        out_specs=(
            pl.BlockSpec(memory_space=pltpu.SMEM),             # loss
            pl.BlockSpec((tq, bp), lambda i: (i, 0)),          # lpi row block
            pl.BlockSpec((bp, tq), lambda i: (0, i)),          # lpt col block
        ),
        scratch_shapes=[
            pltpu.VMEM((1, bp), jnp.float32),                  # running col max
            pltpu.VMEM((1, bp), jnp.float32),                  # running col sumexp
            pltpu.SMEM((1,), jnp.float32),                     # scalar accumulator
        ],
        compiler_params=pltpu.CompilerParams(
            # Column-stat scratch is carried across the row-tile axis.
            dimension_semantics=("arbitrary",),
            vmem_limit_bytes=_vmem_limit_bytes(
                bp, D, tq,
                feat_bytes=mxu_dtype.itemsize,
                out_bytes=out_dtype.itemsize,
                vmem_cap=vmem_cap,
                txt_bufs=1 if single_buffer_txt else 2),
        ),
    )(scale, img, txt)

    loss = loss[0, 0]
    if needs_mask:
        lpi = lpi[:B, :B]
        lpt = lpt[:B, :B]
    return loss, lpi, lpt


def clip_loss_ref(image_features, text_features, logit_scale, mxu_dtype=jnp.float32):
    """Pure-JAX reference mirroring the PyTorch forward.

    `mxu_dtype=jnp.bfloat16` applies the same operand rounding the kernel's
    bf16 MXU path sees (accumulation stays f32 in both)."""
    img = image_features.astype(mxu_dtype).astype(jnp.float32)
    txt = text_features.astype(mxu_dtype).astype(jnp.float32)
    scale = jnp.float32(logit_scale)
    hi = jax.lax.Precision.HIGHEST
    logits_i = scale * jnp.matmul(img, txt.T, precision=hi)
    logits_t = scale * jnp.matmul(txt, img.T, precision=hi)
    n = logits_i.shape[0]
    labels = jnp.arange(n)

    def ce(logits):
        lse = jax.nn.logsumexp(logits, axis=1)
        tgt = logits[jnp.arange(n), labels]
        return jnp.mean(lse - tgt)

    return (ce(logits_i) + ce(logits_t)) / 2.0, logits_i, logits_t


if __name__ == "__main__":
    key = jax.random.PRNGKey(0)
    logit_scale = jnp.float32(1.0 / 0.07)   # CLIP-style exp(log(1/0.07))

    cases = [
        dict(B=8, D=32, dtype=jnp.float32),      # ragged batch -> padded/masked path
        dict(B=256, D=64, dtype=jnp.float32),    # tile-aligned batch -> unmasked path
        dict(B=256, D=64, dtype=jnp.bfloat16),   # bf16 features -> bf16 BxB outputs
    ]
    for idx, c in enumerate(cases):
        B, D, dtype = c["B"], c["D"], c["dtype"]
        k1, k2 = jax.random.split(jax.random.fold_in(key, idx))
        img = jax.random.normal(k1, (B, D), dtype=jnp.float32)
        txt = jax.random.normal(k2, (B, D), dtype=jnp.float32)
        # CLIP features are L2-normalized upstream of the loss.
        img = (img / jnp.linalg.norm(img, axis=-1, keepdims=True)).astype(dtype)
        txt = (txt / jnp.linalg.norm(txt, axis=-1, keepdims=True)).astype(dtype)

        loss, lpi, lpt = clip_loss(img, txt, logit_scale)
        jax.block_until_ready((loss, lpi, lpt))
        assert lpi.shape == (B, B) and lpt.shape == (B, B)

        # Tight check against a reference with the same bf16 operand rounding.
        ref_loss, ref_lpi, ref_lpt = clip_loss_ref(img, txt, logit_scale,
                                                   mxu_dtype=jnp.bfloat16)
        out_tol = 2e-3 if dtype == jnp.float32 else 8e-2   # bf16 output rounding
        assert jnp.allclose(loss, ref_loss, atol=2e-3, rtol=2e-3), (idx, loss, ref_loss)
        assert jnp.allclose(lpi.astype(jnp.float32), ref_lpi, atol=out_tol, rtol=1e-2), idx
        assert jnp.allclose(lpt.astype(jnp.float32), ref_lpt, atol=out_tol, rtol=1e-2), idx

        if dtype == jnp.float32:
            # Loose sanity check vs exact-f32 math: bf16 MXU rounding is benign
            # for unit-normalized CLIP features.
            f32_loss, _, _ = clip_loss_ref(img, txt, logit_scale)
            assert jnp.allclose(loss, f32_loss, atol=1e-1, rtol=5e-2), (idx, loss, f32_loss)

    print("KERNEL_OK")
</pallas_src>

<mosaic_0001>
module attributes {stable_mosaic.version = 11 : i64} {
  func.func @clip_loss_kernel(%arg0: i32, %arg1: memref<1x1xf32, #tpu.memory_space<smem>>, %arg2: memref<128x32xbf16, #tpu.memory_space<vmem>>, %arg3: memref<128x32xbf16, #tpu.memory_space<vmem>>, %arg4: memref<1x1xf32, #tpu.memory_space<smem>>, %arg5: memref<128x128xf32, #tpu.memory_space<vmem>>, %arg6: memref<128x128xf32, #tpu.memory_space<vmem>>, %arg7: memref<1x128xf32, #tpu.memory_space<vmem>>, %arg8: memref<1x128xf32, #tpu.memory_space<vmem>>, %arg9: memref<1xf32, #tpu.memory_space<smem>>) attributes {dimension_semantics = [#tpu.dimension_semantics<arbitrary>], iteration_bounds = array<i64: 1>, scalar_prefetch = 0 : i64, scratch_operands = 3 : i64, tpu.core_type = #tpu.core_type<tc>, window_params = [{transform_indices = @transform_0, window_bounds = array<i64: 1, 1>}, {transform_indices = @transform_1, window_bounds = array<i64: 128, 32>}, {pipeline_mode = #tpu.pipeline_mode<synchronous>, transform_indices = @transform_2, window_bounds = array<i64: 128, 32>}, {transform_indices = @transform_3, window_bounds = array<i64: 1, 1>}, {transform_indices = @transform_4, window_bounds = array<i64: 128, 128>}, {transform_indices = @transform_5, window_bounds = array<i64: 128, 128>}]} {
    %c0_i32 = arith.constant 0 : i32
    %0 = arith.cmpi eq, %arg0, %c0_i32 : i32
    %1 = arith.extui %0 : i1 to i32
    %c0_i32_0 = arith.constant 0 : i32
    %2 = arith.cmpi ne, %1, %c0_i32_0 : i32
    scf.if %2 {
      %cst_37 = arith.constant 0xFF800000 : f32
      %79 = vector.broadcast %cst_37 : f32 to vector<1x128xf32>
      %c0_38 = arith.constant 0 : index
      %c0_39 = arith.constant 0 : index
      %80 = vector.load %arg7[%c0_38, %c0_39] : memref<1x128xf32, #tpu.memory_space<vmem>>, vector<1x128xf32>
      tpu.vector_store %arg7[%c0_38, %c0_39], %79 {strides = array<i32>} : memref<1x128xf32, #tpu.memory_space<vmem>>, vector<1x128xf32>,
      %cst_40 = arith.constant 0.000000e+00 : f32
      %81 = vector.broadcast %cst_40 : f32 to vector<1x128xf32>
      %c0_41 = arith.constant 0 : index
      %c0_42 = arith.constant 0 : index
      %82 = vector.load %arg8[%c0_41, %c0_42] : memref<1x128xf32, #tpu.memory_space<vmem>>, vector<1x128xf32>
      tpu.vector_store %arg8[%c0_41, %c0_42], %81 {strides = array<i32>} : memref<1x128xf32, #tpu.memory_space<vmem>>, vector<1x128xf32>,
      %cst_43 = arith.constant 0.000000e+00 : f32
      %c0_44 = arith.constant 0 : index
      %83 = memref.load %arg9[%c0_44] : memref<1xf32, #tpu.memory_space<smem>>
      memref.store %cst_43, %arg9[%c0_44] : memref<1xf32, #tpu.memory_space<smem>>
    } else {
    }
    %c0 = arith.constant 0 : index
    %c0_1 = arith.constant 0 : index
    %3 = memref.load %arg1[%c0, %c0_1] : memref<1x1xf32, #tpu.memory_space<smem>>
    %c0_2 = arith.constant 0 : index
    %c0_3 = arith.constant 0 : index
    %4 = vector.load %arg2[%c0_2, %c0_3] : memref<128x32xbf16, #tpu.memory_space<vmem>>, vector<128x32xbf16>
    %c0_4 = arith.constant 0 : index
    %c0_5 = arith.constant 0 : index
    %5 = vector.load %arg3[%c0_4, %c0_5] : memref<128x32xbf16, #tpu.memory_space<vmem>>, vector<128x32xbf16>
    %cst = arith.constant dense<0.000000e+00> : vector<128x128xf32>
    %6 = tpu.matmul %4, %5, %cst {dimension_numbers = #tpu.dot_dimension_numbers<[1], [1], [0], [0], [0, 0, 1, 0], [], []>} : vector<128x32xbf16>, vector<128x32xbf16>, vector<128x128xf32> -> vector<128x128xf32>
    %7 = vector.broadcast %3 : f32 to vector<128x128xf32>
    %8 = arith.mulf %6, %7 : vector<128x128xf32>
    %c0_6 = arith.constant 0 : index
    %c0_7 = arith.constant 0 : index
    %9 = vector.load %arg5[%c0_6, %c0_7] : memref<128x128xf32, #tpu.memory_space<vmem>>, vector<128x128xf32>
    tpu.vector_store %arg5[%c0_6, %c0_7], %8 {strides = array<i32>} : memref<128x128xf32, #tpu.memory_space<vmem>>, vector<128x128xf32>,
    %10 = tpu.transpose %8, [1, 0] : vector<128x128xf32> -> vector<128x128xf32>
    %c0_8 = arith.constant 0 : index
    %c0_9 = arith.constant 0 : index
    %11 = vector.load %arg6[%c0_8, %c0_9] : memref<128x128xf32, #tpu.memory_space<vmem>>, vector<128x128xf32>
    tpu.vector_store %arg6[%c0_8, %c0_9], %10 {strides = array<i32>} : memref<128x128xf32, #tpu.memory_space<vmem>>, vector<128x128xf32>,
    %c128_i32 = arith.constant 128 : i32
    %12 = arith.muli %arg0, %c128_i32 : i32
    %13 = tpu.assume_multiple %12, 128 : i32
    %14 = arith.index_cast %13 : i32 to index
    %c0_10 = arith.constant 0 : index
    %15 = vector.load %arg3[%14, %c0_10] : memref<128x32xbf16, #tpu.memory_space<vmem>>, vector<128x32xbf16>
    %16 = arith.extf %4 : vector<128x32xbf16> to vector<128x32xf32>
    %17 = arith.extf %15 : vector<128x32xbf16> to vector<128x32xf32>
    %18 = arith.mulf %16, %17 : vector<128x32xf32>
    %cst_11 = arith.constant dense<0.000000e+00> : vector<128xf32>
    %19 = vector.multi_reduction <add>, %18, %cst_11 [1] : vector<128x32xf32> to vector<128xf32>
    %20 = vector.shape_cast %19 : vector<128xf32> to vector<128x1xf32>
    %21 = vector.broadcast %3 : f32 to vector<128x1xf32>
    %22 = arith.mulf %20, %21 : vector<128x1xf32>
    %23 = tpu.iota {dimensions = array<i32: 1>} : vector<128x128xi32>
    %c128_i32_12 = arith.constant 128 : i32
    %24 = arith.muli %arg0, %c128_i32_12 : i32
    %25 = tpu.iota {dimensions = array<i32: 0>} : vector<128x1xi32>
    %26 = vector.broadcast %24 : i32 to vector<128x1xi32>
    %27 = arith.addi %26, %25 : vector<128x1xi32>
    %c8_i32 = arith.constant 8 : i32
    %28 = vector.broadcast %c8_i32 : i32 to vector<128x1xi32>
    %29 = arith.cmpi slt, %27, %28 : vector<128x1xi32>
    %c8_i32_13 = arith.constant 8 : i32
    %30 = vector.broadcast %c8_i32_13 : i32 to vector<128x128xi32>
    %31 = arith.cmpi slt, %23, %30 : vector<128x128xi32>
    %cst_14 = arith.constant 0xFF800000 : f32
    %32 = vector.broadcast %cst_14 : f32 to vector<128x128xf32>
    %33 = arith.select %31, %8, %32 : vector<128x128xi1>, vector<128x128xf32>
    %cst_15 = arith.constant 0xFF800000 : f32
    %34 = vector.shape_cast %29 : vector<128x1xi1> to vector<128x1xi1>
    %35 = vector.broadcast %34 : vector<128x1xi1> to vector<128x128xi1>
    %36 = vector.broadcast %cst_15 : f32 to vector<128x128xf32>
    %37 = arith.select %35, %8, %36 : vector<128x128xi1>, vector<128x128xf32>
    %cst_16 = arith.constant dense<0xFF800000> : vector<128xf32>
    %38 = vector.multi_reduction <maximumf>, %33, %cst_16 [1] : vector<128x128xf32> to vector<128xf32>
    %39 = vector.shape_cast %38 : vector<128xf32> to vector<128x1xf32>
    %40 = vector.broadcast %39 : vector<128x1xf32> to vector<128x128xf32>
    %41 = arith.subf %33, %40 : vector<128x128xf32>
    %42 = math.exp %41 : vector<128x128xf32>
    %cst_17 = arith.constant dense<0.000000e+00> : vector<128xf32>
    %43 = vector.multi_reduction <add>, %42, %cst_17 [1] : vector<128x128xf32> to vector<128xf32>
    %44 = vector.shape_cast %43 : vector<128xf32> to vector<128x1xf32>
    %45 = math.log %44 : vector<128x1xf32>
    %46 = arith.addf %39, %45 : vector<128x1xf32>
    %cst_18 = arith.constant 2.000000e+00 : f32
    %47 = vector.broadcast %cst_18 : f32 to vector<128x1xf32>
    %48 = arith.mulf %47, %22 : vector<128x1xf32>
    %49 = arith.subf %46, %48 : vector<128x1xf32>
    %cst_19 = arith.constant 0.000000e+00 : f32
    %50 = vector.broadcast %cst_19 : f32 to vector<128x1xf32>
    %51 = arith.select %29, %49, %50 : vector<128x1xi1>, vector<128x1xf32>
    %c0_20 = arith.constant 0 : index
    %52 = memref.load %arg9[%c0_20] : memref<1xf32, #tpu.memory_space<smem>>
    %53 = vector.shape_cast %51 : vector<128x1xf32> to vector<1x128x1xf32>
    %cst_21 = arith.constant dense<0.000000e+00> : vector<1xf32>
    %54 = vector.multi_reduction <add>, %53, %cst_21 [1, 2] : vector<1x128x1xf32> to vector<1xf32>
    %55 = vector.shape_cast %54 : vector<1xf32> to vector<1x1x1xf32>
    %56 = vector.extract %55[0, 0, 0] : f32 from vector<1x1x1xf32>
    %57 = arith.addf %52, %56 : f32
    %c0_22 = arith.constant 0 : index
    %58 = memref.load %arg9[%c0_22] : memref<1xf32, #tpu.memory_space<smem>>
    memref.store %57, %arg9[%c0_22] : memref<1xf32, #tpu.memory_space<smem>>
    %cst_23 = arith.constant dense<0xFF800000> : vector<128xf32>
    %59 = vector.multi_reduction <maximumf>, %37, %cst_23 [0] : vector<128x128xf32> to vector<128xf32>
    %60 = vector.shape_cast %59 : vector<128xf32> to vector<1x128xf32>
    %c0_24 = arith.constant 0 : index
    %c0_25 = arith.constant 0 : index
    %61 = vector.load %arg7[%c0_24, %c0_25] : memref<1x128xf32, #tpu.memory_space<vmem>>, vector<1x128xf32>
    %62 = arith.maximumf %61, %60 : vector<1x128xf32>
    %c0_26 = arith.constant 0 : index
    %c0_27 = arith.constant 0 : index
    %63 = vector.load %arg8[%c0_26, %c0_27] : memref<1x128xf32, #tpu.memory_space<vmem>>, vector<1x128xf32>
    %c0_28 = arith.constant 0 : index
    %c0_29 = arith.constant 0 : index
    %64 = vector.load %arg7[%c0_28, %c0_29] : memref<1x128xf32, #tpu.memory_space<vmem>>, vector<1x128xf32>
    %65 = arith.subf %64, %62 : vector<1x128xf32>
    %66 = math.exp %65 : vector<1x128xf32>
    %67 = arith.mulf %63, %66 : vector<1x128xf32>
    %68 = vector.broadcast %62 : vector<1x128xf32> to vector<128x128xf32>
    %69 = arith.subf %37, %68 : vector<128x128xf32>
    %70 = math.exp %69 : vector<128x128xf32>
    %cst_30 = arith.constant dense<0.000000e+00> : vector<128xf32>
    %71 = vector.multi_reduction <add>, %70, %cst_30 [0] : vector<128x128xf32> to vector<128xf32>
    %72 = vector.shape_cast %71 : vector<128xf32> to vector<1x128xf32>
    %73 = arith.addf %67, %72 : vector<1x128xf32>
    %c0_31 = arith.constant 0 : index
    %c0_32 = arith.constant 0 : index
    %74 = vector.load %arg8[%c0_31, %c0_32] : memref<1x128xf32, #tpu.memory_space<vmem>>, vector<1x128xf32>
    tpu.vector_store %arg8[%c0_31, %c0_32], %73 {strides = array<i32>} : memref<1x128xf32, #tpu.memory_space<vmem>>, vector<1x128xf32>,
    %c0_33 = arith.constant 0 : index
    %c0_34 = arith.constant 0 : index
    %75 = vector.load %arg7[%c0_33, %c0_34] : memref<1x128xf32, #tpu.memory_space<vmem>>, vector<1x128xf32>
    tpu.vector_store %arg7[%c0_33, %c0_34], %62 {strides = array<i32>} : memref<1x128xf32, #tpu.memory_space<vmem>>, vector<1x128xf32>,
    %c0_i32_35 = arith.constant 0 : i32
    %76 = arith.cmpi eq, %arg0, %c0_i32_35 : i32
    %77 = arith.extui %76 : i1 to i32
    %c0_i32_36 = arith.constant 0 : i32
    %78 = arith.cmpi ne, %77, %c0_i32_36 : i32
    scf.if %78 {
      %c0_37 = arith.constant 0 : index
      %c0_38 = arith.constant 0 : index
      %79 = vector.load %arg7[%c0_37, %c0_38] : memref<1x128xf32, #tpu.memory_space<vmem>>, vector<1x128xf32>
      %c0_39 = arith.constant 0 : index
      %c0_40 = arith.constant 0 : index
      %80 = vector.load %arg8[%c0_39, %c0_40] : memref<1x128xf32, #tpu.memory_space<vmem>>, vector<1x128xf32>
      %81 = math.log %80 : vector<1x128xf32>
      %82 = arith.addf %79, %81 : vector<1x128xf32>
      %83 = tpu.iota {dimensions = array<i32: 1>} : vector<1x128xi32>
      %c8_i32_41 = arith.constant 8 : i32
      %84 = vector.broadcast %c8_i32_41 : i32 to vector<1x128xi32>
      %85 = arith.cmpi slt, %83, %84 : vector<1x128xi32>
      %cst_42 = arith.constant 0.000000e+00 : f32
      %86 = vector.broadcast %cst_42 : f32 to vector<1x128xf32>
      %87 = arith.select %85, %82, %86 : vector<1x128xi1>, vector<1x128xf32>
      %c0_43 = arith.constant 0 : index
      %88 = memref.load %arg9[%c0_43] : memref<1xf32, #tpu.memory_space<smem>>
      %89 = vector.shape_cast %87 : vector<1x128xf32> to vector<1x1x128xf32>
      %cst_44 = arith.constant dense<0.000000e+00> : vector<1xf32>
      %90 = vector.multi_reduction <add>, %89, %cst_44 [1, 2] : vector<1x1x128xf32> to vector<1xf32>
      %91 = vector.shape_cast %90 : vector<1xf32> to vector<1x1x1xf32>
      %92 = vector.extract %91[0, 0, 0] : f32 from vector<1x1x1xf32>
      %93 = arith.addf %88, %92 : f32
      %cst_45 = arith.constant 1.600000e+01 : f32
      %94 = arith.divf %93, %cst_45 : f32
      %c0_46 = arith.constant 0 : index
      %c0_47 = arith.constant 0 : index
      %95 = memref.load %arg4[%c0_46, %c0_47] : memref<1x1xf32, #tpu.memory_space<smem>>
      memref.store %94, %arg4[%c0_46, %c0_47] : memref<1x1xf32, #tpu.memory_space<smem>>
    } else {
    }
    return
  }
  func.func @transform_0(%arg0: i32) -> (i32, i32) {
    %c0_i32 = arith.constant 0 : i32
    %c0_i32_0 = arith.constant 0 : i32
    %c0_i32_1 = arith.constant 0 : i32
    return %c0_i32, %c0_i32_0 : i32, i32
  }
  func.func @transform_1(%arg0: i32) -> (i32, i32) {
    %c0_i32 = arith.constant 0 : i32
    %c0_i32_0 = arith.constant 0 : i32
    return %arg0, %c0_i32 : i32, i32
  }
  func.func @transform_2(%arg0: i32) -> (i32, i32) {
    %c0_i32 = arith.constant 0 : i32
    %c0_i32_0 = arith.constant 0 : i32
    %c0_i32_1 = arith.constant 0 : i32
    return %c0_i32, %c0_i32_0 : i32, i32
  }
  func.func @transform_3(%arg0: i32) -> (i32, i32) {
    %c0_i32 = arith.constant 0 : i32
    %c0_i32_0 = arith.constant 0 : i32
    %c0_i32_1 = arith.constant 0 : i32
    return %c0_i32, %c0_i32_0 : i32, i32
  }
  func.func @transform_4(%arg0: i32) -> (i32, i32) {
    %c0_i32 = arith.constant 0 : i32
    %c0_i32_0 = arith.constant 0 : i32
    return %arg0, %c0_i32 : i32, i32
  }
  func.func @transform_5(%arg0: i32) -> (i32, i32) {
    %c0_i32 = arith.constant 0 : i32
    %c0_i32_0 = arith.constant 0 : i32
    return %c0_i32, %arg0 : i32, i32
  }
}

</mosaic_0001>

<bundles_post_ra>
// kernel: tpu_custom_call.1
= control target key start
LH: loop header
LB: loop body
LE: loop exit
PB: predicated region body
PF: predicated region fallthrough
CT: control target
= control target key end

     0   :  { %12 = vsyncpa [#allocation8], 0  ;;  %s1483_s0 = inlined_call_operand.<no memory space> [shape: f32[1,1], index: 0, kind: input, shape index: {}]   ;;  %s1484_s1 = inlined_call_operand.vmem [shape: bf16[128,32], index: 1, kind: input, shape index: {}]   ;;  %s1485_s2 = inlined_call_operand.vmem [shape: bf16[128,32], index: 2, kind: input, shape index: {}]   ;;  %s1486_s3 = inlined_call_operand.hbm [shape: f32[1,1], index: 3, kind: output, shape index: {0}]   ;;  %s1487_s4 = inlined_call_operand.hbm [shape: f32[128,128], index: 4, kind: output, shape index: {1}]   ;;  %s1488_s5 = inlined_call_operand.hbm [shape: f32[128,128], index: 5, kind: output, shape index: {2}]  }
   0x1   :  { %13 = vsyncpa [#allocation7], 0  ;;  %v1207_v0 = vld [vmem:[%s1485_s2 + $0x38] sm:$0xff]   ;;  %vm143_vm0 = vcmask 261120   ;;  %v1208_v1 = vld [vmem:[%s1485_s2 + $0x30] sm:$0xff]  }
   0x2   :  { %1180 = vmatprep.subr.msk.bf16.mxu0 %vm143_vm0, %v1207_v0  ;;  %v190_v2 = vsel %vm143_vm0, %v1207_v0, 0  ;;  %1181 = vmatprep.subr.msk.bf16.mxu1 %vm143_vm0, %v1207_v0  ;;  %v1209_v3 = vld [vmem:[%s1485_s2 + $0x28] sm:$0xff]   ;;  %v187_v4 = vsel %vm143_vm0, %v1208_v1, 0  ;;  %v1345_v5 = vld [vmem:[%s1484_s1] sm:$0xff]  }
   0x3   :  { %1133 = vmatpush3.bf16.xpose.msra.mxu0 %v190_v2  ;;  %1172 = vmatpush3.bf16.xpose.msra.mxu1 %v190_v2 }
   0x4   :  { %1182 = vmatprep.subr.msk.bf16.mxu0 %vm143_vm0, %v1208_v1  ;;  %1183 = vmatprep.subr.msk.bf16.mxu1 %vm143_vm0, %v1208_v1 }
   0x5   :  { %1148 = vmatprep.mubr.msk.bf16.mxu0 %vm143_vm0, %v1345_v5 }
   0xb   :  { %1135 = vmatpush3.bf16.xpose.msra.mxu0 %v187_v4  ;;  %1173 = vmatpush3.bf16.xpose.msra.mxu1 %v187_v4 }
   0xc   :  { %1184 = vmatprep.subr.msk.bf16.mxu0 %vm143_vm0, %v1209_v3  ;;  %1185 = vmatprep.subr.msk.bf16.mxu1 %vm143_vm0, %v1209_v3 }
   0xd   :  { %14 = vsyncpa [#allocation11], 0  ;;  %v184_v6 = vsel %vm143_vm0, %v1209_v3, 0  ;;  %v1210_v7 = vld [vmem:[%s1485_s2 + $0x20] sm:$0xff]   ;;  %v1211_v9 = vld [vmem:[%s1485_s2 + $0x18] sm:$0xff]   ;;  %v1290_v18 = vmov -inf   ;;  %v503_v20 = vlaneseq  ;;  %v1389_v21 = vstv %s1483_s0 }
   0xe   :  { %v181_v8 = vsel %vm143_vm0, %v1210_v7, 0  ;;  %v178_v10 = vsel %vm143_vm0, %v1211_v9, 0  ;;  %v1212_v11 = vld [vmem:[%s1485_s2 + $0x10] sm:$0xff]   ;;  %v1213_v13 = vld [vmem:[%s1485_s2 + $0x8] sm:$0xff]   ;;  %v1214_v15 = vld [vmem:[%s1485_s2] sm:$0xff]   ;;  %v1291_v19 = vmov 0.0   ;;  %v391_v47 = vunpack.c.l.bf16 %v1345_v5 }
   0xf   :  { %v175_v12 = vsel %vm143_vm0, %v1212_v11, 0  ;;  %v172_v14 = vsel %vm143_vm0, %v1213_v13, 0  ;;  %v169_v16 = vsel %vm143_vm0, %v1214_v15, 0  ;;  %v1216_v17 = vld [vmem:[%s1484_s1 + $0x8] sm:$0xff]   ;;  %26 = vst [vmem:[#allocation2] sm:$0x1] %v1290_v18 }
  0x10   :  { %27 = vst [vmem:[#allocation3] sm:$0x1] %v1291_v19  ;;  %v1391_v22 = vand.u32 127, %v503_v20  ;;  %v903_v36 = vshrl.u32 %v503_v20, 7  ;;  %v1078_v49 = vld [vmem:[%s1485_s2] sm:$0xf]  }
  0x11   :  { %v1217_v50 = vld [vmem:[%s1484_s1 + $0x10] sm:$0xff]   ;;  %v1218_v51 = vld [vmem:[%s1484_s1 + $0x18] sm:$0xff]   ;;  %v1079_v53 = vunpack.c.l.bf16 %v1078_v49  ;;  %v1219_v54 = vld [vmem:[%s1484_s1 + $0x20] sm:$0xff]   ;;  %vm989_vm2 = vcmask 1040384   ;;  %vm829_vm3 = vcmask 7168  }
  0x12   :  { %vm555_vm1 = vcmp.lt.s32.totalorder %v1391_v22, 8  ;;  %v904_v40 = vsub.s32 0, %v903_v36  ;;  %v1220_v55 = vld [vmem:[%s1484_s1 + $0x28] sm:$0xff]   ;;  %v1221_v56 = vld [vmem:[%s1484_s1 + $0x30] sm:$0xff]   ;;  %1156 = vmatprep.mubr.msk.bf16.mxu1 %vm143_vm0, %v1219_v54  ;;  %v1222_v63 = vld [vmem:[%s1484_s1 + $0x38] sm:$0xff]   ;;  %s1292_s1 = smov [#allocation9]  }
  0x13   :  { %1137 = vmatpush3.bf16.xpose.msra.mxu0 %v184_v6  ;;  %1174 = vmatpush3.bf16.xpose.msra.mxu1 %v184_v6  ;;  %v423_v58 = vmul.f32 %v1079_v53, %v391_v47  ;;  %s1019_s27 = sshll.u32 %s1292_s1, 4  ;;  %s1020_s27 = int_to_ptr.vmem [resolvable:$true] %s1019_s27 }
  0x14   :  { %1186 = vmatprep.subr.msk.bf16.mxu0 %vm143_vm0, %v1210_v7  ;;  %1187 = vmatprep.subr.msk.bf16.mxu1 %vm143_vm0, %v1210_v7  ;;  %s1236_s28 = scalar_lea.vmem %s1020_s27, 2048  ;;  %p1241_p1 = scmp.lt.s32.totalorder %s1020_s27, %s1020_s27 }
  0x15   :  { %v439_v60 = vsel %vm143_vm0, %v423_v58, 0.0  ;;  %p1237_p0 = scmp.ne.s32.totalorder %s1020_s27, %s1236_s28  ;;  %p1242_p2 = scmp.lt.s32.totalorder %s1236_s28, %s1236_s28 }
  0x16   :  { %v894_v38 = vld [vmem:[#allocation2] sm:$0x1]  ;;  %440 = vadd.xlane.f32.xlu1 %v439_v60 }
  0x17   :  { %v896_v18 = vld [vmem:[#allocation3] sm:$0x1]  ;;  %p1243_p3 = por %p1242_p2, %p1241_p1 }
  0x19   :  { %p1244_p4 = pnand %p1243_p3, %p1237_p0 }
  0x1b   :  { %1139 = vmatpush3.bf16.xpose.msra.mxu0 %v181_v8  ;;  %1175 = vmatpush3.bf16.xpose.msra.mxu1 %v181_v8 }
  0x1c   :  { %1188 = vmatprep.subr.msk.bf16.mxu0 %vm143_vm0, %v1211_v9  ;;  %1189 = vmatprep.subr.msk.bf16.mxu1 %vm143_vm0, %v1211_v9 }
  0x23   :  { %1141 = vmatpush3.bf16.xpose.msra.mxu0 %v178_v10  ;;  %1176 = vmatpush3.bf16.xpose.msra.mxu1 %v178_v10 }
  0x24   :  { %1190 = vmatprep.subr.msk.bf16.mxu0 %vm143_vm0, %v1212_v11  ;;  %1191 = vmatprep.subr.msk.bf16.mxu1 %vm143_vm0, %v1212_v11 }
  0x2b   :  { %1143 = vmatpush3.bf16.xpose.msra.mxu0 %v175_v12  ;;  %1177 = vmatpush3.bf16.xpose.msra.mxu1 %v175_v12 }
  0x2c   :  { %1192 = vmatprep.subr.msk.bf16.mxu0 %vm143_vm0, %v1213_v13  ;;  %1193 = vmatprep.subr.msk.bf16.mxu1 %vm143_vm0, %v1213_v13 }
  0x33   :  { %1145 = vmatpush3.bf16.xpose.msra.mxu0 %v172_v14  ;;  %1178 = vmatpush3.bf16.xpose.msra.mxu1 %v172_v14 }
  0x34   :  { %1194 = vmatprep.subr.msk.bf16.mxu0 %vm143_vm0, %v1214_v15  ;;  %1195 = vmatprep.subr.msk.bf16.mxu1 %vm143_vm0, %v1214_v15 }
  0x3b   :  { %1147 = vmatpush3.bf16.xpose.msra.mxu0 %v169_v16  ;;  %1179 = vmatpush3.bf16.xpose.msra.mxu1 %v169_v16 }
  0x42   :  { %1149 = vmatmul.mubr.msk.bf16.vlgmr.msra.gmra.mxu0 %vm143_vm0, %v1216_v17  ;;  %1157 = vmatmul.mubr.msk.bf16.vlgmr.msra.gmra.mxu1 %vm143_vm0, %v1220_v55 }
  0x43   :  { %1152 = vmatprep.mubr.msk.bf16.mxu0 %vm143_vm0, %v1217_v50  ;;  %1160 = vmatprep.mubr.msk.bf16.mxu1 %vm143_vm0, %v1221_v56 }
  0x4a   :  { %1153 = vmatmul.mubr.msk.bf16.gmra.mxu0 %vm143_vm0, %v1218_v51  ;;  %1161 = vmatmul.mubr.msk.bf16.gmra.mxu1 %vm143_vm0, %v1222_v63 }
 0x102   :  { %v1150_v23 = vpop.f32.mrf.mxu0  ;;  %v1158_v22 = vpop.f32.mrf.mxu1 }
 0x103   :  { %v1394_v24 = vmul.f32 %v1150_v23, %v1389_v21 }
 0x104   :  { %v226_v25 = vpop.f32.mrf.mxu0  ;;  %v258_v49 = vpop.f32.mrf.mxu1 }
 0x105   :  { %308 = vst [vmem:[#allocation9 + $0x10] sm:$0xff] %v1394_v24  ;;  %v1399_v26 = vmul.f32 %v1389_v21, %v226_v25  ;;  %v298_v50 = vmul.f32 %v1389_v21, %v258_v49 }
 0x106   :  { %v1151_v27 = vpop.f32.mrf.mxu0  ;;  %v1159_v51 = vpop.f32.mrf.mxu1 }
 0x107   :  { %306 = vst [vmem:[#allocation9] sm:$0xff] %v1399_v26  ;;  %v888_v28 = vrot.slane %v1399_v26, 4  ;;  %v1404_v29 = vmul.f32 %v1151_v27, %v1389_v21  ;;  %v1409_v30 = vsel %vm555_vm1, %v1399_v26, -inf  ;;  %314 = vst [vmem:[#allocation9 + $0x40] sm:$0xff] %v298_v50 }
 0x108   :  { %620 = vmax.xlane.f32.xlu0 %v1409_v30  ;;  %v229_v31 = vpop.f32.mrf.mxu0  ;;  %v261_v53 = vpop.f32.mrf.mxu1 }
 0x109   :  { %v889_v32 = vmax.f32 %v1399_v26, %v888_v28  ;;  %309 = vst [vmem:[#allocation9 + $0x18] sm:$0xff] %v1404_v29  ;;  %v1415_v33 = vmul.f32 %v1389_v21, %v229_v31  ;;  %v299_v54 = vmul.f32 %v1389_v21, %v261_v53 }
 0x10a   :  { %v1162_v55 = vpop.f32.mrf.mxu1 }
 0x10b   :  { %v890_v34 = vrot.slane %v889_v32, 2  ;;  %307 = vst [vmem:[#allocation9 + $0x8] sm:$0xff] %v1415_v33  ;;  %315 = vst [vmem:[#allocation9 + $0x48] sm:$0xff] %v299_v54  ;;  %v304_v56 = vmul.f32 %v1162_v55, %v1389_v21 }
 0x10d   :  { %v891_v35 = vmax.f32 %v889_v32, %v890_v34  ;;  %320 = vst [vmem:[#allocation9 + $0x70] sm:$0xff] %v304_v56 }
 0x10f   :  { %v892_v37 = vrot.slane %v891_v35, 1 }
 0x111   :  { %v893_v39 = vmax.f32 %v891_v35, %v892_v37 }
 0x113   :  { %v895_v41 = vmax.f32 %v894_v38, %v893_v39 }
 0x115   :  { %v905_v42 = vrot.slane %v895_v41, %v904_v40  ;;  %978 = vst [vmem:[#allocation2] sm:$0x1] %v895_v41  ;;  %v897_v4 = vsub.f32 %v894_v38, %v895_v41  ;;  %v1154_v41 = vpop.f32.mrf.mxu0 }
 0x117   :  { %v907_v43 = vsub.f32 %v1399_v26, %v905_v42  ;;  %v908_v44 = vsub.f32 -inf, %v905_v42  ;;  %v898_v7 = vmul.f32 1.442695, %v897_v4  ;;  %v296_v42 = vmul.f32 %v1154_v41, %v1389_v21 }
 0x119   :  { %v923_v45 = vmul.f32 1.442695, %v907_v43  ;;  %v925_v46 = vmul.f32 1.442695, %v908_v44  ;;  %v242_v43 = vpop.f32.mrf.mxu0  ;;  %312 = vst [vmem:[#allocation9 + $0x30] sm:$0xff] %v296_v42 }
 0x11b   :  { %1224 = vpow2.f32 %v923_v45  ;;  %v1155_v44 = vpop.f32.mrf.mxu0 }
 0x11c   :  { %1226 = vpow2.f32 %v925_v46  ;;  %v982_v36 = vld [vmem:[#allocation2] sm:$0x1]  ;;  %v297_v45 = vmul.f32 %v1155_v44, %v1389_v21 }
 0x11d   :  { %1228 = vpow2.f32 %v898_v7  ;;  %v245_v46 = vpop.f32.mrf.mxu0 }
 0x11e   :  { %313 = vst [vmem:[#allocation9 + $0x38] sm:$0xff] %v297_v45  ;;  %v295_v47 = vmul.f32 %v1389_v21, %v245_v46 }
 0x120   :  { %311 = vst [vmem:[#allocation9 + $0x28] sm:$0xff] %v295_v47 }
 0x128   :  { %v1225_v48 = vpop.eup %1224 }
 0x129   :  { %v1227_v52 = vpop.eup %1226 }
 0x12a   :  { %v955_v57 = vadd.f32 %v1227_v52, %v1225_v48  ;;  %v1229_v17 = vpop.eup %1228  ;;  %v300_v48 = vmul.f32 %v1158_v22, %v1389_v21 }
 0x12b   :  { %v900_v20 = vmul.f32 %v1229_v17, %v896_v18 }
 0x12c   :  { %v956_v59 = vadd.f32 %v1227_v52, %v955_v57  ;;  %316 = vst [vmem:[#allocation9 + $0x50] sm:$0xff] %v300_v48  ;;  %v274_v57 = vpop.f32.mrf.mxu1 }
 0x12d   :  { %v302_v58 = vmul.f32 %v1389_v21, %v274_v57 }
 0x12e   :  { %v957_v61 = vadd.f32 %v1227_v52, %v956_v59  ;;  %v1163_v59 = vpop.f32.mrf.mxu1 }
 0x12f   :  { %318 = vst [vmem:[#allocation9 + $0x60] sm:$0xff] %v302_v58  ;;  %v305_v60 = vmul.f32 %v1163_v59, %v1389_v21 }
 0x130   :  { %v958_v62 = vadd.f32 %v1227_v52, %v957_v61  ;;  %v277_v61 = vpop.f32.mrf.mxu1 }
 0x131   :  { %321 = vst [vmem:[#allocation9 + $0x78] sm:$0xff] %v305_v60 }
 0x132   :  { %v959_v0 = vadd.f32 %v1227_v52, %v958_v62  ;;  %v303_v62 = vmul.f32 %v1389_v21, %v277_v61 }
 0x134   :  { %v960_v1 = vadd.f32 %v1227_v52, %v959_v0  ;;  %319 = vst [vmem:[#allocation9 + $0x68] sm:$0xff] %v303_v62  ;;  %v441_v0 = vpop.xlane.xlu1 %440 }
 0x136   :  { %v961_v2 = vadd.f32 %v1227_v52, %v960_v1  ;;  %v487_v1 = vmul.f32 %v441_v0, %v1389_v21 }
 0x138   :  { %v962_v3 = vadd.f32 %v1227_v52, %v961_v2  ;;  %v780_v4 = vmul.f32 2.0, %v487_v1 }
 0x13a   :  { %v963_v5 = vadd.f32 %v1227_v52, %v962_v3 }
 0x13c   :  { %v964_v6 = vadd.f32 %v1227_v52, %v963_v5 }
 0x13e   :  { %v965_v8 = vadd.f32 %v1227_v52, %v964_v6 }
 0x140   :  { %v966_v9 = vadd.f32 %v1227_v52, %v965_v8 }
 0x142   :  { %v967_v10 = vadd.f32 %v1227_v52, %v966_v9 }
 0x144   :  { %v968_v11 = vadd.f32 %v1227_v52, %v967_v10 }
 0x146   :  { %v969_v12 = vadd.f32 %v1227_v52, %v968_v11  ;;  %v301_v52 = vmul.f32 %v1159_v51, %v1389_v21 }
 0x148   :  { %v970_v13 = vrot.slane %v969_v12, 4  ;;  %317 = vst [vmem:[#allocation9 + $0x58] sm:$0xff] %v301_v52 }
 0x14a   :  { %v971_v14 = vadd.f32 %v970_v13, %v969_v12 }
 0x14c   :  { %v972_v15 = vrot.slane %v971_v14, 2 }
 0x14e   :  { %v973_v16 = vadd.f32 %v972_v15, %v971_v14 }
 0x150   :  { %v974_v19 = vrot.slane %v973_v16, 1 }
 0x152   :  { %v975_v23 = vadd.f32 %v974_v19, %v973_v16 }
 0x154   :  { %v976_v25 = vadd.f32 %v975_v23, %v900_v20 }
 0x156   :  { %977 = vst [vmem:[#allocation3] sm:$0x1] %v976_v25 }
 0x15d   :  { %v983_v27 = vld [vmem:[#allocation3] sm:$0x1] }
 0x15e   :  { %1230 = vlog2.f32 %v983_v27 }
 0x16b   :  { %v1231_v34 = vpop.eup %1230 }
 0x16c   :  { %v985_v35 = vmul.f32 0.6931472, %v1231_v34 }
 0x16e   :  { %v986_v37 = vadd.f32 %v985_v35, %v982_v36 }
 0x170   :  { %v987_v39 = vsel %vm555_vm1, %v986_v37, 0.0 }
 0x171   :  { %v990_v40 = vsel %vm989_vm2, %v987_v39, 0.0 }
 0x191   :  { %v621_v28 = vpop.xlane.xlu0 %620 }
 0x192   :  { %v652_v31 = vsub.f32 %v1409_v30, %v621_v28  ;;  %v294_v30 = vmul.f32 %v1389_v21, %v242_v43 }
 0x194   :  { %v668_v32 = vmul.f32 1.442695, %v652_v31  ;;  %310 = vst [vmem:[#allocation9 + $0x20] sm:$0xff] %v294_v30 }
 0x196   :  { %1232 = vpow2.f32 %v668_v32 }
 0x1a3   :  { %v1233_v38 = vpop.eup %1232 }
 0x1a4   :  { %700 = vadd.xlane.f32.xlu0 %v1233_v38 }
 0x1a8   :  { %991 = vadd.xlane.f32.xlu0 %v990_v40 }
 0x22d   :  { %v701_v63 = vpop.xlane.xlu0 %700 }
 0x22e   :  { %1234 = vlog2.f32 %v701_v63 }
 0x23b   :  { %v1235_v2 = vpop.eup %1234 }
 0x23c   :  { %v733_v3 = vmul.f32 0.6931472, %v1235_v2 }
 0x23e   :  { %v764_v5 = vadd.f32 %v733_v3, %v621_v28 }
 0x240   :  { %v796_v6 = vsub.f32 %v764_v5, %v780_v4 }
 0x242   :  { %v830_v7 = vsel %vm829_vm3, %v796_v6, 0.0 }
 0x243   :  { %861 = vadd.xlane.f32.xlu1 %v830_v7 }
 0x276   :  { %322 = vxpose.xlu1.b32.start [1/16] %v1399_v26, 128 }
 0x27a   :  { %323 = vxpose.xlu1.b32.cont [2/16] %v1415_v33, 128 }
 0x27e   :  { %324 = vxpose.xlu1.b32.cont [3/16] %v1394_v24, 128 }
 0x282   :  { %325 = vxpose.xlu1.b32.cont [4/16] %v1404_v29, 128 }
 0x286   :  { %326 = vxpose.xlu1.b32.cont [5/16] %v294_v30, 128 }
 0x28a   :  { %327 = vxpose.xlu1.b32.cont [6/16] %v295_v47, 128 }
 0x28e   :  { %328 = vxpose.xlu1.b32.cont [7/16] %v296_v42, 128 }
 0x292   :  { %329 = vxpose.xlu1.b32.cont [8/16] %v297_v45, 128 }
 0x296   :  { %330 = vxpose.xlu1.b32.cont [9/16] %v298_v50, 128 }
 0x29a   :  { %331 = vxpose.xlu1.b32.cont [10/16] %v299_v54, 128 }
 0x29e   :  { %332 = vxpose.xlu1.b32.cont [11/16] %v300_v48, 128 }
 0x2a2   :  { %333 = vxpose.xlu1.b32.cont [12/16] %v301_v52, 128 }
 0x2a6   :  { %334 = vxpose.xlu1.b32.cont [13/16] %v302_v58, 128 }
 0x2aa   :  { %335 = vxpose.xlu1.b32.cont [14/16] %v303_v62, 128 }
 0x2ae   :  { %336 = vxpose.xlu1.b32.cont [15/16] %v304_v56, 128 }
 0x2b2   :  { %337 = vxpose.xlu1.b32.end [16/16] %v305_v60, 128 }
 0x2b3   :  { %1247 = shalt.err (!%p1244_p4)
}
 0x2b4   :  { %s1293_s29 = smov 128   ;;  %s1294_s30 = smov 8   ;;  %v992_v21 = vpop.xlane.xlu0 %991 }
 0x2b5   :  { %1025 = dma.vmem_to_hbm [thread:$0]  %s1020_s27, 2048, %s1487_s4, [#allocation7], %s1293_s29, %s1293_s29, %s1294_s30   ;;  %v993_v24 = vrot.slane %v992_v21, 4 }
 0x2b6   :  { %s1295_s11 = smov [#allocation6]   ;;  %s1296_s14 = smov [#allocation10]  }
 0x2b7   :  { %v994_v26 = vadd.f32 %v993_v24, %v992_v21  ;;  %s1031_s0 = sshll.u32 %s1296_s14, 4  ;;  %s1032_s0 = int_to_ptr.vmem [resolvable:$true] %s1031_s0 }
 0x2b8   :  { %p1269_p6 = scmp.lt.s32.totalorder %s1032_s0, %s1032_s0 }
 0x2b9   :  { %v995_v29 = vrot.slane %v994_v26, 2 }
 0x2bb   :  { %v996_v10 = vadd.f32 %v995_v29, %v994_v26 }
 0x2bd   :  { %v997_v13 = vrot.slane %v996_v10, 1 }
 0x2bf   :  { %v998_v16 = vadd.f32 %v997_v13, %v996_v10 }
 0x2cc   :  { %v862_v33 = vpop.xlane.xlu1 %861 }
 0x2cd   :  { %v863_v8 = vrot.slane %v862_v33, 4 }
 0x2cf   :  { %v864_v9 = vadd.f32 %v863_v8, %v862_v33 }
 0x2d1   :  { %v865_v11 = vrot.slane %v864_v9, 2 }
 0x2d3   :  { %v866_v12 = vadd.f32 %v865_v11, %v864_v9 }
 0x2d5   :  { %v867_v14 = vrot.slane %v866_v12, 1 }
 0x2d7   :  { %v868_v15 = vadd.f32 %v867_v14, %v866_v12 }
 0x2d9   :  { %1196 = vpush %v868_v15 }
 0x2da   :  { %1198 = vpush %v998_v16 }
 0x2f2   :  { %v338_v17 = vpop.trf.xlu1 }
 0x2f3   :  { %354 = vst [vmem:[#allocation10] sm:$0xff] %v338_v17 }
 0x2f6   :  { %v339_v18 = vpop.trf.xlu1 }
 0x2f7   :  { %355 = vst [vmem:[#allocation10 + $0x8] sm:$0xff] %v339_v18 }
 0x2fa   :  { %v340_v19 = vpop.trf.xlu1 }
 0x2fb   :  { %356 = vst [vmem:[#allocation10 + $0x10] sm:$0xff] %v340_v19 }
 0x2fe   :  { %v341_v20 = vpop.trf.xlu1 }
 0x2ff   :  { %357 = vst [vmem:[#allocation10 + $0x18] sm:$0xff] %v341_v20 }
 0x302   :  { %v342_v23 = vpop.trf.xlu1 }
 0x303   :  { %358 = vst [vmem:[#allocation10 + $0x20] sm:$0xff] %v342_v23 }
 0x306   :  { %v343_v25 = vpop.trf.xlu1 }
 0x307   :  { %359 = vst [vmem:[#allocation10 + $0x28] sm:$0xff] %v343_v25 }
 0x30a   :  { %s1197_s4 = spop %1196  ;;  %v344_v27 = vpop.trf.xlu1 }
 0x30b   :  { %360 = vst [vmem:[#allocation10 + $0x30] sm:$0xff] %v344_v27  ;;  %s1199_s8 = spop %1198 }
 0x30c   :  { %s1000_s9 = sadd.f32 %s1199_s8, %s1197_s4 }
 0x30e   :  { %v345_v28 = vpop.trf.xlu1  ;;  %s1003_s10 = smul.f32 0.0625, %s1000_s9 }
 0x30f   :  { %361 = vst [vmem:[#allocation10 + $0x38] sm:$0xff] %v345_v28 }
 0x310   :  { %1005 = sst [smem:[#allocation6]] %s1003_s10 }
 0x311   :  { %1013 = dma.smem_to_hbm %s1295_s11, 16, %s1486_s3, [#allocation8]  }
 0x312   :  { %v346_v31 = vpop.trf.xlu1  ;;  %s1264_s3 = scalar_lea.vmem %s1032_s0, 2048 }
 0x313   :  { %362 = vst [vmem:[#allocation10 + $0x40] sm:$0xff] %v346_v31  ;;  %p1265_p5 = scmp.ne.s32.totalorder %s1032_s0, %s1264_s3  ;;  %p1270_p7 = scmp.lt.s32.totalorder %s1264_s3, %s1264_s3 }
 0x315   :  { %p1271_p8 = por %p1270_p7, %p1269_p6 }
 0x316   :  { %v347_v32 = vpop.trf.xlu1 }
 0x317   :  { %363 = vst [vmem:[#allocation10 + $0x48] sm:$0xff] %v347_v32  ;;  %p1272_p9 = pnand %p1271_p8, %p1265_p5 }
 0x31a   :  { %v348_v34 = vpop.trf.xlu1 }
 0x31b   :  { %364 = vst [vmem:[#allocation10 + $0x50] sm:$0xff] %v348_v34 }
 0x31e   :  { %v349_v35 = vpop.trf.xlu1 }
 0x31f   :  { %365 = vst [vmem:[#allocation10 + $0x58] sm:$0xff] %v349_v35 }
 0x322   :  { %v350_v36 = vpop.trf.xlu1 }
 0x323   :  { %366 = vst [vmem:[#allocation10 + $0x60] sm:$0xff] %v350_v36 }
 0x326   :  { %v351_v37 = vpop.trf.xlu1 }
 0x327   :  { %367 = vst [vmem:[#allocation10 + $0x68] sm:$0xff] %v351_v37 }
 0x32a   :  { %v352_v38 = vpop.trf.xlu1 }
 0x32b   :  { %368 = vst [vmem:[#allocation10 + $0x70] sm:$0xff] %v352_v38 }
 0x32e   :  { %v353_v39 = vpop.trf.xlu1 }
 0x32f   :  { %369 = vst [vmem:[#allocation10 + $0x78] sm:$0xff] %v353_v39 }
 0x330   :  { %1275 = shalt.err (!%p1272_p9)
}
 0x331   :  { %1037 = dma.vmem_to_hbm [thread:$0]  %s1032_s0, 2048, %s1488_s5, [#allocation11], %s1293_s29, %s1293_s29, %s1294_s30  }
 0x332   :  { %1284 = dma.done.wait [#allocation8], 16  }
 0x333   :  { %1285 = vsyncadd [#allocation8], 4294967280 }
 0x334   :  { %1286 = dma.done.wait [#allocation7], 2048  }
 0x335   :  { %1287 = vsyncadd [#allocation7], 4294965248 }
 0x336   :  { %1288 = dma.done.wait [#allocation11], 2048  }
 0x337   :  { %1289 = vsyncadd [#allocation11], 4294965248 }
 0x338   :  { %1047 = sfence }
 0x339   :  { %1048 = vsyncpa [#allocation7], 1 }
 0x33a   :  { %1049 = vsyncpa [#allocation11], 1 }
 0x33b   :  { %1050 = vsyncpa [#allocation8], 1 }

</bundles_post_ra>
